<compile_context>
chip_gen: v5e
topology: v5e:2x2
jax: 0.10.0
libtpu: 0.0.40
codegen_flags: <defaults>
</compile_context>

<pallas_src>
import functools

import jax
import jax.numpy as jnp
from jax import lax
from jax.experimental import pallas as pl
from jax.experimental.pallas import tpu as pltpu

LANES = 128
SUBLANES = 8
MAX_BLOCK_ROWS = 2048  # (2048,128) f32 = 1 MiB per input block


def _focal_kernel(x_ref, t_ref, o_ref, *, gamma, n_valid, block_rows):
    i = pl.program_id(0)

    x = x_ref[...].astype(jnp.float32)
    t = t_ref[...].astype(jnp.float32)

    # Stable BCE-with-logits, simplified:
    #   x - x*t + max(-x,0) + log(exp(-max(-x,0)) + exp(-x-max(-x,0)))
    # == max(x,0) - x*t + log1p(exp(-|x|))
    bce = jnp.maximum(x, 0.0) - x * t + jnp.log1p(jnp.exp(-jnp.abs(x)))

    # logsigmoid(z) with z = -x*(2t-1), stable form
    z = -x * (t * 2.0 - 1.0)
    invprobs = jnp.minimum(z, 0.0) - jnp.log1p(jnp.exp(-jnp.abs(z)))

    loss = jnp.exp(invprobs * gamma) * bce

    # In-kernel validity mask for the zero-padded lane tail and the ragged
    # last grid block (no mask array streamed from HBM).
    row = lax.broadcasted_iota(jnp.int32, (block_rows, LANES), 0)
    lane = lax.broadcasted_iota(jnp.int32, (block_rows, LANES), 1)
    flat = (i * block_rows + row) * LANES + lane
    loss = jnp.where(flat < n_valid, loss, 0.0)

    # Per-lane partial sums for this block: (block_rows,128) -> (8,128).
    # The reshape keeps (8,128) vreg slabs intact, so the reduce is plain
    # VPU vreg adds; the single cross-lane reduce happens in the wrapper.
    partial = loss.reshape(block_rows // SUBLANES, SUBLANES, LANES).sum(axis=0)
    o_ref[0] = partial


def focal_loss(inp, target, gamma):
    if inp.shape != target.shape:
        raise ValueError(
            "Target size ({}) must be the same as input size ({})".format(
                target.shape, inp.shape))

    n = inp.size
    x = inp.reshape(-1)
    t = target.reshape(-1)

    # Pad only the lane remainder (<=127 elems) so we can view as (rows, 128).
    pad = (-n) % LANES
    if pad:
        x = jnp.pad(x, (0, pad))
        t = jnp.pad(t, (0, pad))
    rows = (n + pad) // LANES

    block_rows = min(MAX_BLOCK_ROWS, pl.cdiv(rows, SUBLANES) * SUBLANES)
    num_blocks = pl.cdiv(rows, block_rows)

    x2 = x.reshape(rows, LANES)
    t2 = t.reshape(rows, LANES)

    in_blk = pl.BlockSpec((block_rows, LANES), lambda i: (i, 0))
    out_blk = pl.BlockSpec((1, SUBLANES, LANES), lambda i: (i, 0, 0))

    kernel = functools.partial(
        _focal_kernel, gamma=float(gamma), n_valid=n, block_rows=block_rows)

    partials = pl.pallas_call(
        kernel,
        out_shape=jax.ShapeDtypeStruct((num_blocks, SUBLANES, LANES),
                                       jnp.float32),
        grid_spec=pltpu.PrefetchScalarGridSpec(
            num_scalar_prefetch=0,
            grid=(num_blocks,),
            in_specs=[in_blk, in_blk],
            out_specs=out_blk,
        ),
        compiler_params=pltpu.CompilerParams(
            dimension_semantics=("parallel",),
            vmem_limit_bytes=32 * 1024 * 1024,
        ),
    )(x2, t2)

    # Tiny final reduction + mean (num_blocks * 8 * 128 f32 values).
    return jnp.sum(partials) * (1.0 / float(n))


def focal_loss_ref(inp, target, gamma):
    # Faithful transcription of the PyTorch reference formula.
    x = inp.astype(jnp.float32)
    t = target.astype(jnp.float32)
    max_val = jnp.maximum(-x, 0.0)
    loss = x - x * t + max_val + jnp.log(jnp.exp(-max_val) + jnp.exp(-x - max_val))
    invprobs = jax.nn.log_sigmoid(-x * (t * 2.0 - 1.0))
    loss = jnp.exp(invprobs * gamma) * loss
    return jnp.mean(loss)


if __name__ == "__main__":
    key = jax.random.PRNGKey(0)
    k1, k2 = jax.random.split(key)
    shape = (2, 4, 16, 16)  # NCHW, same shape for input (logits) and target
    gamma = 2.0

    logits = jax.random.normal(k1, shape, dtype=jnp.float32) * 3.0
    target = (jax.random.uniform(k2, shape) > 0.5).astype(jnp.float32)

    out = focal_loss(logits, target, gamma)
    out = jax.block_until_ready(out)

    ref = focal_loss_ref(logits, target, gamma)
    assert jnp.allclose(out, ref, rtol=1e-5, atol=1e-6), (out, ref)

    print("KERNEL_OK")
</pallas_src>

<mosaic_0001>
module attributes {stable_mosaic.version = 11 : i64} {
  func.func @_focal_kernel(%arg0: i32, %arg1: memref<16x128xf32, #tpu.memory_space<vmem>>, %arg2: memref<16x128xf32, #tpu.memory_space<vmem>>, %arg3: memref<1x8x128xf32, #tpu.memory_space<vmem>>) attributes {dimension_semantics = [#tpu.dimension_semantics<parallel>], iteration_bounds = array<i64: 1>, scalar_prefetch = 0 : i64, scratch_operands = 0 : i64, tpu.core_type = #tpu.core_type<tc>, window_params = [{transform_indices = @transform_0, window_bounds = array<i64: 16, 128>}, {transform_indices = @transform_1, window_bounds = array<i64: 16, 128>}, {transform_indices = @transform_2, window_bounds = array<i64: 1, 8, 128>}]} {
    %c0 = arith.constant 0 : index
    %c0_0 = arith.constant 0 : index
    %0 = vector.load %arg1[%c0, %c0_0] : memref<16x128xf32, #tpu.memory_space<vmem>>, vector<16x128xf32>
    %c0_1 = arith.constant 0 : index
    %c0_2 = arith.constant 0 : index
    %1 = vector.load %arg2[%c0_1, %c0_2] : memref<16x128xf32, #tpu.memory_space<vmem>>, vector<16x128xf32>
    %cst = arith.constant 0.000000e+00 : f32
    %2 = vector.broadcast %cst : f32 to vector<16x128xf32>
    %3 = arith.maximumf %0, %2 : vector<16x128xf32>
    %4 = arith.mulf %0, %1 : vector<16x128xf32>
    %5 = arith.subf %3, %4 : vector<16x128xf32>
    %6 = math.absf %0 : vector<16x128xf32>
    %cst_3 = arith.constant 0.000000e+00 : f32
    %7 = vector.broadcast %cst_3 : f32 to vector<16x128xf32>
    %8 = arith.subf %7, %6 : vector<16x128xf32>
    %9 = math.exp %8 : vector<16x128xf32>
    %10 = math.log1p %9 : vector<16x128xf32>
    %11 = arith.addf %5, %10 : vector<16x128xf32>
    %cst_4 = arith.constant 0.000000e+00 : f32
    %12 = vector.broadcast %cst_4 : f32 to vector<16x128xf32>
    %13 = arith.subf %12, %0 : vector<16x128xf32>
    %cst_5 = arith.constant 2.000000e+00 : f32
    %14 = vector.broadcast %cst_5 : f32 to vector<16x128xf32>
    %15 = arith.mulf %1, %14 : vector<16x128xf32>
    %cst_6 = arith.constant 1.000000e+00 : f32
    %16 = vector.broadcast %cst_6 : f32 to vector<16x128xf32>
    %17 = arith.subf %15, %16 : vector<16x128xf32>
    %18 = arith.mulf %13, %17 : vector<16x128xf32>
    %cst_7 = arith.constant 0.000000e+00 : f32
    %19 = vector.broadcast %cst_7 : f32 to vector<16x128xf32>
    %20 = arith.minimumf %18, %19 : vector<16x128xf32>
    %21 = math.absf %18 : vector<16x128xf32>
    %cst_8 = arith.constant 0.000000e+00 : f32
    %22 = vector.broadcast %cst_8 : f32 to vector<16x128xf32>
    %23 = arith.subf %22, %21 : vector<16x128xf32>
    %24 = math.exp %23 : vector<16x128xf32>
    %25 = math.log1p %24 : vector<16x128xf32>
    %26 = arith.subf %20, %25 : vector<16x128xf32>
    %cst_9 = arith.constant 2.000000e+00 : f32
    %27 = vector.broadcast %cst_9 : f32 to vector<16x128xf32>
    %28 = arith.mulf %26, %27 : vector<16x128xf32>
    %29 = math.exp %28 : vector<16x128xf32>
    %30 = arith.mulf %29, %11 : vector<16x128xf32>
    %31 = tpu.iota {dimensions = array<i32: 0>} : vector<16x128xi32>
    %32 = tpu.iota {dimensions = array<i32: 1>} : vector<16x128xi32>
    %c16_i32 = arith.constant 16 : i32
    %33 = arith.muli %arg0, %c16_i32 : i32
    %34 = vector.broadcast %33 : i32 to vector<16x128xi32>
    %35 = arith.addi %34, %31 : vector<16x128xi32>
    %c128_i32 = arith.constant 128 : i32
    %36 = vector.broadcast %c128_i32 : i32 to vector<16x128xi32>
    %37 = arith.muli %35, %36 : vector<16x128xi32>
    %38 = arith.addi %37, %32 : vector<16x128xi32>
    %c2048_i32 = arith.constant 2048 : i32
    %39 = vector.broadcast %c2048_i32 : i32 to vector<16x128xi32>
    %40 = arith.cmpi slt, %38, %39 : vector<16x128xi32>
    %cst_10 = arith.constant 0.000000e+00 : f32
    %41 = vector.broadcast %cst_10 : f32 to vector<16x128xf32>
    %42 = arith.select %40, %30, %41 : vector<16x128xi1>, vector<16x128xf32>
    %43 = vector.shape_cast %42 : vector<16x128xf32> to vector<2x8x128xf32>
    %cst_11 = arith.constant dense<0.000000e+00> : vector<8x128xf32>
    %44 = vector.multi_reduction <add>, %43, %cst_11 [0] : vector<2x8x128xf32> to vector<8x128xf32>
    %c0_12 = arith.constant 0 : index
    %c0_13 = arith.constant 0 : index
    %c0_14 = arith.constant 0 : index
    %45 = vector.load %arg3[%c0_12, %c0_13, %c0_14] : memref<1x8x128xf32, #tpu.memory_space<vmem>>, vector<1x8x128xf32>
    %46 = vector.shape_cast %45 : vector<1x8x128xf32> to vector<8x128xf32>
    %47 = vector.shape_cast %44 : vector<8x128xf32> to vector<1x8x128xf32>
    tpu.vector_store %arg3[%c0_12, %c0_13, %c0_14], %47 {strides = array<i32>} : memref<1x8x128xf32, #tpu.memory_space<vmem>>, vector<1x8x128xf32>,
    return
  }
  func.func @transform_0(%arg0: i32) -> (i32, i32) {
    %c0_i32 = arith.constant 0 : i32
    %c0_i32_0 = arith.constant 0 : i32
    return %arg0, %c0_i32 : i32, i32
  }
  func.func @transform_1(%arg0: i32) -> (i32, i32) {
    %c0_i32 = arith.constant 0 : i32
    %c0_i32_0 = arith.constant 0 : i32
    return %arg0, %c0_i32 : i32, i32
  }
  func.func @transform_2(%arg0: i32) -> (i32, i32, i32) {
    %c0_i32 = arith.constant 0 : i32
    %c0_i32_0 = arith.constant 0 : i32
    %c0_i32_1 = arith.constant 0 : i32
    return %arg0, %c0_i32, %c0_i32_0 : i32, i32, i32
  }
}

</mosaic_0001>

<bundles_post_ra>
// kernel: tpu_custom_call.1
= control target key start
LH: loop header
LB: loop body
LE: loop exit
PB: predicated region body
PF: predicated region fallthrough
CT: control target
= control target key end

     0   :  { %7 = vsyncpa [#allocation3], 0  ;;  %s325_s0 = inlined_call_operand.hbm [shape: f32[16,128], index: 0, kind: input, shape index: {}]   ;;  %s326_s1 = inlined_call_operand.hbm [shape: f32[16,128], index: 1, kind: input, shape index: {}]   ;;  %s327_s2 = inlined_call_operand.hbm [shape: f32[1,8,128], index: 2, kind: output, shape index: {}]  }
   0x1   :  { %8 = vsyncpa [#allocation6], 0 }
   0x2   :  { %9 = vsyncpa [#allocation4], 0  ;;  %s14_s11 = sshll.u32 %s325_s0, 4  ;;  %s270_s12 = smov [#allocation2]   ;;  %s15_s11 = int_to_ptr.hbm [resolvable:$true] %s14_s11 }
   0x3   :  { %s16_s13 = sshll.u32 %s270_s12, 4  ;;  %s27_s16 = sshll.u32 %s326_s1, 4  ;;  %s17_s13 = int_to_ptr.vmem [resolvable:$true] %s16_s13  ;;  %s28_s16 = int_to_ptr.hbm [resolvable:$true] %s27_s16 }
   0x4   :  { %s271_s17 = smov 128   ;;  %s272_s18 = smov 8  }
   0x5   :  { %22 = dma.hbm_to_vmem [thread:$0]  %s15_s11, 256, %s17_s13, [#allocation3], %s271_s17, %s271_s17, %s272_s18  }
   0x6   :  { %s273_s19 = smov [#allocation5]  }
   0x7   :  { %s29_s20 = sshll.u32 %s273_s19, 4  ;;  %s30_s20 = int_to_ptr.vmem [resolvable:$true] %s29_s20 }
   0x8   :  { %35 = dma.hbm_to_vmem [thread:$0]  %s28_s16, 256, %s30_s20, [#allocation6], %s271_s17, %s271_s17, %s272_s18  }
   0x9   :  { %264 = dma.done.wait [#allocation3], 256  }
   0xa   :  { %265 = vsyncadd [#allocation3], 4294967040 }
   0xb   :  { %266 = dma.done.wait [#allocation6], 256  }
   0xc   :  { %267 = vsyncadd [#allocation6], 4294967040  ;;  %v296_v0 = vld [vmem:[#allocation2] sm:$0xff]  ;;  %v298_v1 = vld [vmem:[#allocation2 + $0x8] sm:$0xff]  ;;  %v128_v40 = vlaneseq  ;;  %s274_s0 = smov [#allocation7]   ;;  %s154_s23 = sshll.u32 %s327_s2, 4  ;;  %s155_s23 = int_to_ptr.hbm [resolvable:$true] %s154_s23 }
   0xd   :  { %v46_v2 = vld [vmem:[#allocation5] sm:$0xff]  ;;  %v300_v3 = vld [vmem:[#allocation5 + $0x8] sm:$0xff]  ;;  %v54_v4 = vand.u32 2147483647, %v296_v0  ;;  %v82_v5 = vsub.f32 0.0, %v296_v0  ;;  %v83_v6 = vsub.f32 0.0, %v298_v1 }
   0xe   :  { %v84_v7 = vmul.f32 2.0, %v46_v2  ;;  %v85_v8 = vmul.f32 2.0, %v300_v3  ;;  %v55_v9 = vand.u32 2147483647, %v298_v1  ;;  %v129_v52 = vshrl.u32 %v128_v40, 7  ;;  %s152_s1 = sshll.u32 %s274_s0, 4  ;;  %s153_s1 = int_to_ptr.vmem [resolvable:$true] %s152_s1 }
   0xf   :  { %v56_v10 = vsub.f32 0.0, %v54_v4  ;;  %v48_v53 = vmax.f32 %v296_v0, 0.0  ;;  %v50_v54 = vmul.f32 %v46_v2, %v296_v0  ;;  %v49_v4 = vmax.f32 %v298_v1, 0.0 }
  0x10   :  { %v165_v11 = vadd.f32 -1.0, %v84_v7  ;;  %v166_v12 = vadd.f32 -1.0, %v85_v8  ;;  %v57_v15 = vsub.f32 0.0, %v55_v9  ;;  %v130_v7 = vadd.s32 8, %v129_v52 }
  0x11   :  { %v58_v16 = vmul.f32 1.442695, %v56_v10  ;;  %v51_v0 = vmul.f32 %v300_v3, %v298_v1  ;;  %v52_v2 = vsub.f32 %v48_v53, %v50_v54  ;;  %v132_v9 = vand.u32 127, %v128_v40 }
  0x12   :  { %v88_v13 = vmul.f32 %v165_v11, %v82_v5  ;;  %v307_v14 = vmul.f32 %v166_v12, %v83_v6  ;;  %v60_v21 = vmul.f32 1.442695, %v57_v15 }
  0x13   :  { %172 = vpow2.f32 %v58_v16  ;;  %v138_v16 = vmul.u32 128, %v130_v7 }
  0x14   :  { %v92_v17 = vand.u32 2147483647, %v88_v13  ;;  %v93_v18 = vand.u32 2147483647, %v307_v14  ;;  %v90_v42 = vmin.f32 %v88_v13, 0.0  ;;  %v91_v47 = vmin.f32 %v307_v14, 0.0 }
  0x15   :  { %v137_v13 = vmul.u32 128, %v129_v52  ;;  %v140_v1 = vadd.s32 %v138_v16, %v132_v9 }
  0x16   :  { %v94_v19 = vsub.f32 0.0, %v92_v17  ;;  %v95_v20 = vsub.f32 0.0, %v93_v18  ;;  %v53_v17 = vsub.f32 %v49_v4, %v51_v0 }
  0x17   :  { %vm142_vm5 = vcmp.lt.s32.totalorder %v140_v1, 2048 }
  0x18   :  { %v96_v22 = vmul.f32 1.442695, %v94_v19  ;;  %v98_v23 = vmul.f32 1.442695, %v95_v20  ;;  %v139_v20 = vadd.s32 %v137_v13, %v132_v9 }
  0x19   :  { %v173_v24 = vpop.eup %172 }
  0x1a   :  { %174 = vpow2.f32 %v96_v22  ;;  %v62_v26 = vadd.f32 1.0, %v173_v24  ;;  %v65_v36 = vmul.f32 -0.5, %v173_v24  ;;  %v68_v50 = vand.u32 2147483647, %v173_v24 }
  0x1b   :  { %176 = vpow2.f32 %v60_v21  ;;  %vm141_vm4 = vcmp.lt.s32.totalorder %v139_v20, 2048 }
  0x1c   :  { %178 = vpow2.f32 %v98_v23  ;;  %v66_v46 = vadd.f32 1.0, %v65_v36  ;;  %vm314_vm2 = vcmp.lt.f32.partialorder %v68_v50, 0.0004427343 }
  0x1e   :  { %v67_v61 = vmul.f32 %v173_v24, %v66_v46 }
  0x20   :  { %v175_v25 = vpop.eup %174 }
  0x21   :  { %v100_v27 = vadd.f32 1.0, %v175_v25  ;;  %v103_v28 = vmul.f32 -0.5, %v175_v25  ;;  %v177_v29 = vpop.eup %176  ;;  %v106_v35 = vand.u32 2147483647, %v175_v25 }
  0x22   :  { %v179_v30 = vpop.eup %178  ;;  %v71_v34 = vadd.f32 1.0, %v177_v29  ;;  %v74_v43 = vmul.f32 -0.5, %v177_v29  ;;  %v77_v58 = vand.u32 2147483647, %v177_v29 }
  0x23   :  { %180 = vlog2.f32 %v100_v27  ;;  %v104_v31 = vadd.f32 1.0, %v103_v28  ;;  %v109_v32 = vadd.f32 1.0, %v179_v30  ;;  %v112_v33 = vmul.f32 -0.5, %v179_v30 }
  0x24   :  { %182 = vlog2.f32 %v62_v26  ;;  %v115_v39 = vand.u32 2147483647, %v179_v30  ;;  %vm107_vm0 = vcmp.lt.f32.partialorder %v106_v35, 0.0004427343  ;;  %v75_v57 = vadd.f32 1.0, %v74_v43 }
  0x25   :  { %184 = vlog2.f32 %v109_v32  ;;  %v113_v37 = vadd.f32 1.0, %v112_v33  ;;  %v105_v38 = vmul.f32 %v175_v25, %v104_v31  ;;  %vm78_vm3 = vcmp.lt.f32.partialorder %v77_v58, 0.0004427343 }
  0x26   :  { %186 = vlog2.f32 %v71_v34  ;;  %vm116_vm1 = vcmp.lt.f32.partialorder %v115_v39, 0.0004427343  ;;  %v76_v11 = vmul.f32 %v177_v29, %v75_v57 }
  0x27   :  { %v114_v48 = vmul.f32 %v179_v30, %v113_v37 }
  0x29   :  { %v181_v41 = vpop.eup %180 }
  0x2a   :  { %v102_v44 = vmul.f32 0.6931472, %v181_v41  ;;  %v183_v45 = vpop.eup %182 }
  0x2b   :  { %v185_v49 = vpop.eup %184  ;;  %v64_v60 = vmul.f32 0.6931472, %v183_v45 }
  0x2c   :  { %v108_v51 = vsel %vm107_vm0, %v105_v38, %v102_v44  ;;  %v111_v55 = vmul.f32 0.6931472, %v185_v49  ;;  %v187_v59 = vpop.eup %186 }
  0x2d   :  { %v118_v56 = vsub.f32 %v90_v42, %v108_v51  ;;  %v73_v10 = vmul.f32 0.6931472, %v187_v59  ;;  %v70_v14 = vsel %vm314_vm2, %v67_v61, %v64_v60 }
  0x2e   :  { %v117_v62 = vsel %vm116_vm1, %v114_v48, %v111_v55  ;;  %v80_v19 = vadd.f32 %v70_v14, %v52_v2 }
  0x2f   :  { %v120_v63 = vmul.f32 2.0, %v118_v56  ;;  %v119_v6 = vsub.f32 %v91_v47, %v117_v62  ;;  %v79_v18 = vsel %vm78_vm3, %v76_v11, %v73_v10 }
  0x30   :  { %v81_v21 = vadd.f32 %v79_v18, %v53_v17 }
  0x31   :  { %v122_v8 = vmul.f32 1.442695, %v120_v63  ;;  %v121_v12 = vmul.f32 2.0, %v119_v6 }
  0x33   :  { %188 = vpow2.f32 %v122_v8  ;;  %v124_v15 = vmul.f32 1.442695, %v121_v12 }
  0x35   :  { %190 = vpow2.f32 %v124_v15 }
  0x39   :  { %v189_v3 = vpop.eup %188 }
  0x3a   :  { %v126_v22 = vmul.f32 %v189_v3, %v80_v19 }
  0x3b   :  { %v191_v23 = vpop.eup %190 }
  0x3c   :  { %v127_v24 = vmul.f32 %v191_v23, %v81_v21  ;;  %v143_v25 = vsel %vm141_vm4, %v126_v22, 0.0 }
  0x3e   :  { %v144_v26 = vsel %vm142_vm5, %v127_v24, 0.0 }
  0x3f   :  { %v145_v27 = vadd.f32 %v144_v26, %v143_v25 }
  0x41   :  { %146 = vst [vmem:[#allocation7] sm:$0xff] %v145_v27 }
  0x42   :  { %157 = dma.vmem_to_hbm [thread:$0]  %s153_s1, 128, %s155_s23, [#allocation4]  }
  0x43   :  { %268 = dma.done.wait [#allocation4], 128  }
  0x44   :  { %269 = vsyncadd [#allocation4], 4294967168 }
  0x45   :  { %162 = vsyncpa [#allocation3], 1 }
  0x46   :  { %163 = vsyncpa [#allocation6], 1 }
  0x47   :  { %164 = vsyncpa [#allocation4], 1 }

</bundles_post_ra>
